<compile_context>
chip_gen: v7x
topology: tpu7x:2x2x1
jax: 0.10.0
libtpu: 0.0.40
codegen_flags: <defaults>
</compile_context>

<pallas_src>
import jax
import jax.numpy as jnp
from jax import lax
from jax.experimental import pallas as pl
from jax.experimental.pallas import tpu as pltpu

LN_EPS = 1e-5  # PyTorch nn.LayerNorm default


def _layernorm(x, gamma, beta):
    mean = jnp.mean(x, axis=-1, keepdims=True)
    var = jnp.mean((x - mean) ** 2, axis=-1, keepdims=True)  # biased, like torch
    return (x - mean) * lax.rsqrt(var + LN_EPS) * gamma + beta


def masknet_kernel(
    x_ref,       # (TB, D)      raw feature_emb tile
    ge_ref,      # (1, D)       ln_emb gamma
    be_ref,      # (1, D)       ln_emb beta
    w1_ref,      # (D, n*A)     all blocks' mask-gen Linear1 weights, packed wide
    b1_ref,      # (1, n*A)
    w2_ref,      # (n, A, D)    mask-gen Linear2, stacked per block
    b2_ref,      # (n, 1, D)
    wf_ref,      # (n, D, H)    ffn Linear, stacked per block
    bf_ref,      # (n, 1, H)
    gf_ref,      # (n, 1, H)    ffn LayerNorm gamma
    gb_ref,      # (n, 1, H)    ffn LayerNorm beta
    out_ref,     # (TB, n*H)
):
    n = w2_ref.shape[0]
    A = w2_ref.shape[1]

    x = x_ref[...]                                          # (TB, D) f32

    # Shared LayerNorm of the raw embedding — computed once per batch tile.
    ln = _layernorm(x, ge_ref[...], be_ref[...])            # (TB, D)

    # Mask-generator Linear1 for ALL blocks in one wide MXU matmul.
    h1 = jnp.dot(x, w1_ref[...], preferred_element_type=jnp.float32) + b1_ref[...]
    h1 = jnp.maximum(h1, 0.0)                               # (TB, n*A)

    outs = []
    for i in range(n):                                      # static, unrolled
        h1_i = h1[:, i * A:(i + 1) * A]                     # (TB, A)
        w_i = jnp.dot(h1_i, w2_ref[i],
                      preferred_element_type=jnp.float32) + b2_ref[i]   # (TB, D)
        weighted = ln * w_i                                 # (TB, D)
        f = jnp.dot(weighted, wf_ref[i],
                    preferred_element_type=jnp.float32) + bf_ref[i]     # (TB, H)
        fn = _layernorm(f, gf_ref[i], gb_ref[i])
        outs.append(jnp.maximum(fn, 0.0))

    # One lane-dense full-width store (matches torch.concat(..., dim=-1) order).
    out_ref[...] = jnp.concatenate(outs, axis=-1)


def _round_up(x, m):
    return ((x + m - 1) // m) * m


def masknet_forward(feature_emb, params, *, b_tile=None):
    """Parallel MaskNet forward.  feature_emb: (B, D) f32 -> (B, n_blocks*H) f32."""
    B, D = feature_emb.shape
    n, A, _ = params["w2"].shape
    H = params["wf"].shape[2]

    # Pack Linear1 of every block into one wide operand (one-time, tiny reshape).
    w1_all = jnp.transpose(params["w1"], (1, 0, 2)).reshape(D, n * A)   # (D, n*A)
    b1_all = params["b1"].reshape(1, n * A)

    # Batch tiling (sublane-aligned, multiple of 8).
    if b_tile is None:
        b_tile = min(256, _round_up(B, 8))
    TB = max(8, (b_tile // 8) * 8)
    B_pad = _round_up(B, TB)
    x = feature_emb
    if B_pad != B:
        x = jnp.pad(x, ((0, B_pad - B), (0, 0)))

    # VMEM budget from the actual working set (4x headroom, clamped for v7x).
    f32 = 4
    weight_bytes = (D * n * A + n * A + n * A * D + n * D + n * D * H + 3 * n * H) * f32
    io_bytes = 2 * (TB * D + TB * n * H) * f32              # double-buffered tiles
    vmem_bytes = int(min(max(4 * (weight_bytes + io_bytes), 16 << 20), 64 << 20))

    out = pl.pallas_call(
        masknet_kernel,
        out_shape=jax.ShapeDtypeStruct((B_pad, n * H), jnp.float32),
        grid_spec=pltpu.PrefetchScalarGridSpec(
            num_scalar_prefetch=0,
            grid=(B_pad // TB,),
            in_specs=[
                pl.BlockSpec((TB, D), lambda b: (b, 0)),
                # All weights: constant index_map -> DMA'd once, VMEM-resident.
                pl.BlockSpec((1, D), lambda b: (0, 0)),
                pl.BlockSpec((1, D), lambda b: (0, 0)),
                pl.BlockSpec((D, n * A), lambda b: (0, 0)),
                pl.BlockSpec((1, n * A), lambda b: (0, 0)),
                pl.BlockSpec((n, A, D), lambda b: (0, 0, 0)),
                pl.BlockSpec((n, 1, D), lambda b: (0, 0, 0)),
                pl.BlockSpec((n, D, H), lambda b: (0, 0, 0)),
                pl.BlockSpec((n, 1, H), lambda b: (0, 0, 0)),
                pl.BlockSpec((n, 1, H), lambda b: (0, 0, 0)),
                pl.BlockSpec((n, 1, H), lambda b: (0, 0, 0)),
            ],
            out_specs=pl.BlockSpec((TB, n * H), lambda b: (b, 0)),
        ),
        compiler_params=pltpu.CompilerParams(
            dimension_semantics=("parallel",),
            vmem_limit_bytes=vmem_bytes,
        ),
    )(
        x,
        params["ln_g"], params["ln_b"],
        w1_all, b1_all,
        params["w2"], params["b2"],
        params["wf"], params["bf"],
        params["ffn_ln_g"], params["ffn_ln_b"],
    )
    return out[:B] if B_pad != B else out


def masknet_reference(feature_emb, params):
    """Pure-JAX reference of the PyTorch forward, for validation."""
    x = feature_emb
    ln = _layernorm(x, params["ln_g"], params["ln_b"])
    outs = []
    for i in range(params["w1"].shape[0]):
        h1 = jnp.maximum(x @ params["w1"][i] + params["b1"][i], 0.0)
        w = h1 @ params["w2"][i] + params["b2"][i]
        we = ln * w
        f = we @ params["wf"][i] + params["bf"][i]
        fn = _layernorm(f, params["ffn_ln_g"][i], params["ffn_ln_b"][i])
        outs.append(jnp.maximum(fn, 0.0))
    return jnp.concatenate(outs, axis=-1)


def init_params(key, feature_dim, n_blocks, hidden_dim, reduction_ratio=2.0):
    """Deterministic synthetic parameters (PyTorch-Linear-style uniform init)."""
    D = feature_dim
    A = int(D * reduction_ratio)   # aggregation_dim (parallel: input_dim == feature_dim)
    H = hidden_dim
    ks = jax.random.split(key, 8)

    def unif(k, shape, fan_in):
        bound = 1.0 / jnp.sqrt(fan_in)
        return jax.random.uniform(k, shape, jnp.float32, -bound, bound)

    return {
        # ln_emb (shared across blocks) — LayerNorm init: gamma=1, beta=0
        "ln_g": jnp.ones((1, D), jnp.float32),
        "ln_b": jnp.zeros((1, D), jnp.float32),
        # mask_generator Linear(D->A), Linear(A->D) ; weights stored (in, out)
        "w1": unif(ks[0], (n_blocks, D, A), D),
        "b1": unif(ks[1], (n_blocks, 1, A), D),
        "w2": unif(ks[2], (n_blocks, A, D), A),
        "b2": unif(ks[3], (n_blocks, 1, D), A),
        # ffn Linear(D->H) + LayerNorm(H)
        "wf": unif(ks[4], (n_blocks, D, H), D),
        "bf": unif(ks[5], (n_blocks, 1, H), D),
        "ffn_ln_g": jnp.ones((n_blocks, 1, H), jnp.float32),
        "ffn_ln_b": jnp.zeros((n_blocks, 1, H), jnp.float32),
    }


if __name__ == "__main__":
    B, D, H, N_BLOCKS = 16, 32, 32, 2
    key = jax.random.PRNGKey(0)
    k_x, k_p = jax.random.split(key)
    feature_emb = jax.random.normal(k_x, (B, D), jnp.float32)
    params = init_params(k_p, D, N_BLOCKS, H, reduction_ratio=2.0)

    fwd = jax.jit(masknet_forward, static_argnames=("b_tile",))
    out = fwd(feature_emb, params, b_tile=8)   # 2 batch tiles -> exercises the grid
    out = jax.block_until_ready(out)

    ref = masknet_reference(feature_emb, params)
    assert out.shape == (B, N_BLOCKS * H), out.shape
    assert jnp.allclose(out, ref, atol=1e-5, rtol=1e-5), float(jnp.max(jnp.abs(out - ref)))
    print("KERNEL_OK")
</pallas_src>

<mosaic_0001>
module attributes {stable_mosaic.version = 11 : i64} {
  func.func @masknet_kernel(%arg0: i32, %arg1: memref<8x32xf32, #tpu.memory_space<vmem>>, %arg2: memref<1x32xf32, #tpu.memory_space<vmem>>, %arg3: memref<1x32xf32, #tpu.memory_space<vmem>>, %arg4: memref<32x128xf32, #tpu.memory_space<vmem>>, %arg5: memref<1x128xf32, #tpu.memory_space<vmem>>, %arg6: memref<2x64x32xf32, #tpu.memory_space<vmem>>, %arg7: memref<2x1x32xf32, #tpu.memory_space<vmem>>, %arg8: memref<2x32x32xf32, #tpu.memory_space<vmem>>, %arg9: memref<2x1x32xf32, #tpu.memory_space<vmem>>, %arg10: memref<2x1x32xf32, #tpu.memory_space<vmem>>, %arg11: memref<2x1x32xf32, #tpu.memory_space<vmem>>, %arg12: memref<8x64xf32, #tpu.memory_space<vmem>>) attributes {dimension_semantics = [#tpu.dimension_semantics<parallel>], iteration_bounds = array<i64: 2>, scalar_prefetch = 0 : i64, scratch_operands = 0 : i64, tpu.core_type = #tpu.core_type<tc>, window_params = [{transform_indices = @transform_0, window_bounds = array<i64: 8, 32>}, {pipeline_mode = #tpu.pipeline_mode<synchronous>, transform_indices = @transform_1, window_bounds = array<i64: 1, 32>}, {pipeline_mode = #tpu.pipeline_mode<synchronous>, transform_indices = @transform_2, window_bounds = array<i64: 1, 32>}, {pipeline_mode = #tpu.pipeline_mode<synchronous>, transform_indices = @transform_3, window_bounds = array<i64: 32, 128>}, {pipeline_mode = #tpu.pipeline_mode<synchronous>, transform_indices = @transform_4, window_bounds = array<i64: 1, 128>}, {pipeline_mode = #tpu.pipeline_mode<synchronous>, transform_indices = @transform_5, window_bounds = array<i64: 2, 64, 32>}, {pipeline_mode = #tpu.pipeline_mode<synchronous>, transform_indices = @transform_6, window_bounds = array<i64: 2, 1, 32>}, {pipeline_mode = #tpu.pipeline_mode<synchronous>, transform_indices = @transform_7, window_bounds = array<i64: 2, 32, 32>}, {pipeline_mode = #tpu.pipeline_mode<synchronous>, transform_indices = @transform_8, window_bounds = array<i64: 2, 1, 32>}, {pipeline_mode = #tpu.pipeline_mode<synchronous>, transform_indices = @transform_9, window_bounds = array<i64: 2, 1, 32>}, {pipeline_mode = #tpu.pipeline_mode<synchronous>, transform_indices = @transform_10, window_bounds = array<i64: 2, 1, 32>}, {transform_indices = @transform_11, window_bounds = array<i64: 8, 64>}]} {
    %c0 = arith.constant 0 : index
    %c0_0 = arith.constant 0 : index
    %0 = vector.load %arg1[%c0, %c0_0] : memref<8x32xf32, #tpu.memory_space<vmem>>, vector<8x32xf32>
    %c0_1 = arith.constant 0 : index
    %c0_2 = arith.constant 0 : index
    %1 = vector.load %arg2[%c0_1, %c0_2] : memref<1x32xf32, #tpu.memory_space<vmem>>, vector<1x32xf32>
    %c0_3 = arith.constant 0 : index
    %c0_4 = arith.constant 0 : index
    %2 = vector.load %arg3[%c0_3, %c0_4] : memref<1x32xf32, #tpu.memory_space<vmem>>, vector<1x32xf32>
    %cst = arith.constant dense<0.000000e+00> : vector<8xf32>
    %3 = vector.multi_reduction <add>, %0, %cst [1] : vector<8x32xf32> to vector<8xf32>
    %4 = vector.shape_cast %3 : vector<8xf32> to vector<8x1xf32>
    %cst_5 = arith.constant 3.200000e+01 : f32
    %5 = vector.broadcast %cst_5 : f32 to vector<8x1xf32>
    %6 = arith.divf %4, %5 : vector<8x1xf32>
    %7 = vector.broadcast %6 : vector<8x1xf32> to vector<8x32xf32>
    %8 = arith.subf %0, %7 : vector<8x32xf32>
    %9 = arith.mulf %8, %8 : vector<8x32xf32>
    %cst_6 = arith.constant dense<0.000000e+00> : vector<8xf32>
    %10 = vector.multi_reduction <add>, %9, %cst_6 [1] : vector<8x32xf32> to vector<8xf32>
    %11 = vector.shape_cast %10 : vector<8xf32> to vector<8x1xf32>
    %cst_7 = arith.constant 3.200000e+01 : f32
    %12 = vector.broadcast %cst_7 : f32 to vector<8x1xf32>
    %13 = arith.divf %11, %12 : vector<8x1xf32>
    %14 = vector.broadcast %6 : vector<8x1xf32> to vector<8x32xf32>
    %15 = arith.subf %0, %14 : vector<8x32xf32>
    %cst_8 = arith.constant 9.99999974E-6 : f32
    %16 = vector.broadcast %cst_8 : f32 to vector<8x1xf32>
    %17 = arith.addf %13, %16 : vector<8x1xf32>
    %18 = math.rsqrt %17 : vector<8x1xf32>
    %19 = vector.broadcast %18 : vector<8x1xf32> to vector<8x32xf32>
    %20 = arith.mulf %15, %19 : vector<8x32xf32>
    %21 = vector.broadcast %1 : vector<1x32xf32> to vector<8x32xf32>
    %22 = arith.mulf %20, %21 : vector<8x32xf32>
    %23 = vector.broadcast %2 : vector<1x32xf32> to vector<8x32xf32>
    %24 = arith.addf %22, %23 : vector<8x32xf32>
    %c0_9 = arith.constant 0 : index
    %c0_10 = arith.constant 0 : index
    %25 = vector.load %arg4[%c0_9, %c0_10] : memref<32x128xf32, #tpu.memory_space<vmem>>, vector<32x128xf32>
    %cst_11 = arith.constant dense<0.000000e+00> : vector<8x128xf32>
    %26 = tpu.matmul %0, %25, %cst_11 {dimension_numbers = #tpu.dot_dimension_numbers<[1], [0], [0], [1], [0, 0, 1, 1], [], []>} : vector<8x32xf32>, vector<32x128xf32>, vector<8x128xf32> -> vector<8x128xf32>
    %c0_12 = arith.constant 0 : index
    %c0_13 = arith.constant 0 : index
    %27 = vector.load %arg5[%c0_12, %c0_13] : memref<1x128xf32, #tpu.memory_space<vmem>>, vector<1x128xf32>
    %28 = vector.broadcast %27 : vector<1x128xf32> to vector<8x128xf32>
    %29 = arith.addf %26, %28 : vector<8x128xf32>
    %cst_14 = arith.constant 0.000000e+00 : f32
    %30 = vector.broadcast %cst_14 : f32 to vector<8x128xf32>
    %31 = arith.maximumf %29, %30 : vector<8x128xf32>
    %32 = vector.extract_strided_slice %31 {offsets = [0, 0], sizes = [8, 64], strides = [1, 1]} : vector<8x128xf32> to vector<8x64xf32>
    %c0_15 = arith.constant 0 : index
    %c0_16 = arith.constant 0 : index
    %c0_17 = arith.constant 0 : index
    %33 = vector.load %arg6[%c0_15, %c0_16, %c0_17] : memref<2x64x32xf32, #tpu.memory_space<vmem>>, vector<1x64x32xf32>
    %34 = vector.shape_cast %33 : vector<1x64x32xf32> to vector<64x32xf32>
    %cst_18 = arith.constant dense<0.000000e+00> : vector<8x32xf32>
    %35 = tpu.matmul %32, %34, %cst_18 {dimension_numbers = #tpu.dot_dimension_numbers<[1], [0], [0], [1], [0, 0, 1, 1], [], []>} : vector<8x64xf32>, vector<64x32xf32>, vector<8x32xf32> -> vector<8x32xf32>
    %c0_19 = arith.constant 0 : index
    %c0_20 = arith.constant 0 : index
    %c0_21 = arith.constant 0 : index
    %36 = vector.load %arg7[%c0_19, %c0_20, %c0_21] : memref<2x1x32xf32, #tpu.memory_space<vmem>>, vector<1x1x32xf32>
    %37 = vector.shape_cast %36 : vector<1x1x32xf32> to vector<1x32xf32>
    %38 = vector.broadcast %37 : vector<1x32xf32> to vector<8x32xf32>
    %39 = arith.addf %35, %38 : vector<8x32xf32>
    %40 = arith.mulf %24, %39 : vector<8x32xf32>
    %c0_22 = arith.constant 0 : index
    %c0_23 = arith.constant 0 : index
    %c0_24 = arith.constant 0 : index
    %41 = vector.load %arg8[%c0_22, %c0_23, %c0_24] : memref<2x32x32xf32, #tpu.memory_space<vmem>>, vector<1x32x32xf32>
    %42 = vector.shape_cast %41 : vector<1x32x32xf32> to vector<32x32xf32>
    %cst_25 = arith.constant dense<0.000000e+00> : vector<8x32xf32>
    %43 = tpu.matmul %40, %42, %cst_25 {dimension_numbers = #tpu.dot_dimension_numbers<[1], [0], [0], [1], [0, 0, 1, 1], [], []>} : vector<8x32xf32>, vector<32x32xf32>, vector<8x32xf32> -> vector<8x32xf32>
    %c0_26 = arith.constant 0 : index
    %c0_27 = arith.constant 0 : index
    %c0_28 = arith.constant 0 : index
    %44 = vector.load %arg9[%c0_26, %c0_27, %c0_28] : memref<2x1x32xf32, #tpu.memory_space<vmem>>, vector<1x1x32xf32>
    %45 = vector.shape_cast %44 : vector<1x1x32xf32> to vector<1x32xf32>
    %46 = vector.broadcast %45 : vector<1x32xf32> to vector<8x32xf32>
    %47 = arith.addf %43, %46 : vector<8x32xf32>
    %c0_29 = arith.constant 0 : index
    %c0_30 = arith.constant 0 : index
    %c0_31 = arith.constant 0 : index
    %48 = vector.load %arg10[%c0_29, %c0_30, %c0_31] : memref<2x1x32xf32, #tpu.memory_space<vmem>>, vector<1x1x32xf32>
    %49 = vector.shape_cast %48 : vector<1x1x32xf32> to vector<1x32xf32>
    %c0_32 = arith.constant 0 : index
    %c0_33 = arith.constant 0 : index
    %c0_34 = arith.constant 0 : index
    %50 = vector.load %arg11[%c0_32, %c0_33, %c0_34] : memref<2x1x32xf32, #tpu.memory_space<vmem>>, vector<1x1x32xf32>
    %51 = vector.shape_cast %50 : vector<1x1x32xf32> to vector<1x32xf32>
    %cst_35 = arith.constant dense<0.000000e+00> : vector<8xf32>
    %52 = vector.multi_reduction <add>, %47, %cst_35 [1] : vector<8x32xf32> to vector<8xf32>
    %53 = vector.shape_cast %52 : vector<8xf32> to vector<8x1xf32>
    %cst_36 = arith.constant 3.200000e+01 : f32
    %54 = vector.broadcast %cst_36 : f32 to vector<8x1xf32>
    %55 = arith.divf %53, %54 : vector<8x1xf32>
    %56 = vector.broadcast %55 : vector<8x1xf32> to vector<8x32xf32>
    %57 = arith.subf %47, %56 : vector<8x32xf32>
    %58 = arith.mulf %57, %57 : vector<8x32xf32>
    %cst_37 = arith.constant dense<0.000000e+00> : vector<8xf32>
    %59 = vector.multi_reduction <add>, %58, %cst_37 [1] : vector<8x32xf32> to vector<8xf32>
    %60 = vector.shape_cast %59 : vector<8xf32> to vector<8x1xf32>
    %cst_38 = arith.constant 3.200000e+01 : f32
    %61 = vector.broadcast %cst_38 : f32 to vector<8x1xf32>
    %62 = arith.divf %60, %61 : vector<8x1xf32>
    %63 = vector.broadcast %55 : vector<8x1xf32> to vector<8x32xf32>
    %64 = arith.subf %47, %63 : vector<8x32xf32>
    %cst_39 = arith.constant 9.99999974E-6 : f32
    %65 = vector.broadcast %cst_39 : f32 to vector<8x1xf32>
    %66 = arith.addf %62, %65 : vector<8x1xf32>
    %67 = math.rsqrt %66 : vector<8x1xf32>
    %68 = vector.broadcast %67 : vector<8x1xf32> to vector<8x32xf32>
    %69 = arith.mulf %64, %68 : vector<8x32xf32>
    %70 = vector.broadcast %49 : vector<1x32xf32> to vector<8x32xf32>
    %71 = arith.mulf %69, %70 : vector<8x32xf32>
    %72 = vector.broadcast %51 : vector<1x32xf32> to vector<8x32xf32>
    %73 = arith.addf %71, %72 : vector<8x32xf32>
    %cst_40 = arith.constant 0.000000e+00 : f32
    %74 = vector.broadcast %cst_40 : f32 to vector<8x32xf32>
    %75 = arith.maximumf %73, %74 : vector<8x32xf32>
    %76 = vector.extract_strided_slice %31 {offsets = [0, 64], sizes = [8, 64], strides = [1, 1]} : vector<8x128xf32> to vector<8x64xf32>
    %c1 = arith.constant 1 : index
    %c0_41 = arith.constant 0 : index
    %c0_42 = arith.constant 0 : index
    %77 = vector.load %arg6[%c1, %c0_41, %c0_42] : memref<2x64x32xf32, #tpu.memory_space<vmem>>, vector<1x64x32xf32>
    %78 = vector.shape_cast %77 : vector<1x64x32xf32> to vector<64x32xf32>
    %cst_43 = arith.constant dense<0.000000e+00> : vector<8x32xf32>
    %79 = tpu.matmul %76, %78, %cst_43 {dimension_numbers = #tpu.dot_dimension_numbers<[1], [0], [0], [1], [0, 0, 1, 1], [], []>} : vector<8x64xf32>, vector<64x32xf32>, vector<8x32xf32> -> vector<8x32xf32>
    %c1_44 = arith.constant 1 : index
    %c0_45 = arith.constant 0 : index
    %c0_46 = arith.constant 0 : index
    %80 = vector.load %arg7[%c1_44, %c0_45, %c0_46] : memref<2x1x32xf32, #tpu.memory_space<vmem>>, vector<1x1x32xf32>
    %81 = vector.shape_cast %80 : vector<1x1x32xf32> to vector<1x32xf32>
    %82 = vector.broadcast %81 : vector<1x32xf32> to vector<8x32xf32>
    %83 = arith.addf %79, %82 : vector<8x32xf32>
    %84 = arith.mulf %24, %83 : vector<8x32xf32>
    %c1_47 = arith.constant 1 : index
    %c0_48 = arith.constant 0 : index
    %c0_49 = arith.constant 0 : index
    %85 = vector.load %arg8[%c1_47, %c0_48, %c0_49] : memref<2x32x32xf32, #tpu.memory_space<vmem>>, vector<1x32x32xf32>
    %86 = vector.shape_cast %85 : vector<1x32x32xf32> to vector<32x32xf32>
    %cst_50 = arith.constant dense<0.000000e+00> : vector<8x32xf32>
    %87 = tpu.matmul %84, %86, %cst_50 {dimension_numbers = #tpu.dot_dimension_numbers<[1], [0], [0], [1], [0, 0, 1, 1], [], []>} : vector<8x32xf32>, vector<32x32xf32>, vector<8x32xf32> -> vector<8x32xf32>
    %c1_51 = arith.constant 1 : index
    %c0_52 = arith.constant 0 : index
    %c0_53 = arith.constant 0 : index
    %88 = vector.load %arg9[%c1_51, %c0_52, %c0_53] : memref<2x1x32xf32, #tpu.memory_space<vmem>>, vector<1x1x32xf32>
    %89 = vector.shape_cast %88 : vector<1x1x32xf32> to vector<1x32xf32>
    %90 = vector.broadcast %89 : vector<1x32xf32> to vector<8x32xf32>
    %91 = arith.addf %87, %90 : vector<8x32xf32>
    %c1_54 = arith.constant 1 : index
    %c0_55 = arith.constant 0 : index
    %c0_56 = arith.constant 0 : index
    %92 = vector.load %arg10[%c1_54, %c0_55, %c0_56] : memref<2x1x32xf32, #tpu.memory_space<vmem>>, vector<1x1x32xf32>
    %93 = vector.shape_cast %92 : vector<1x1x32xf32> to vector<1x32xf32>
    %c1_57 = arith.constant 1 : index
    %c0_58 = arith.constant 0 : index
    %c0_59 = arith.constant 0 : index
    %94 = vector.load %arg11[%c1_57, %c0_58, %c0_59] : memref<2x1x32xf32, #tpu.memory_space<vmem>>, vector<1x1x32xf32>
    %95 = vector.shape_cast %94 : vector<1x1x32xf32> to vector<1x32xf32>
    %cst_60 = arith.constant dense<0.000000e+00> : vector<8xf32>
    %96 = vector.multi_reduction <add>, %91, %cst_60 [1] : vector<8x32xf32> to vector<8xf32>
    %97 = vector.shape_cast %96 : vector<8xf32> to vector<8x1xf32>
    %cst_61 = arith.constant 3.200000e+01 : f32
    %98 = vector.broadcast %cst_61 : f32 to vector<8x1xf32>
    %99 = arith.divf %97, %98 : vector<8x1xf32>
    %100 = vector.broadcast %99 : vector<8x1xf32> to vector<8x32xf32>
    %101 = arith.subf %91, %100 : vector<8x32xf32>
    %102 = arith.mulf %101, %101 : vector<8x32xf32>
    %cst_62 = arith.constant dense<0.000000e+00> : vector<8xf32>
    %103 = vector.multi_reduction <add>, %102, %cst_62 [1] : vector<8x32xf32> to vector<8xf32>
    %104 = vector.shape_cast %103 : vector<8xf32> to vector<8x1xf32>
    %cst_63 = arith.constant 3.200000e+01 : f32
    %105 = vector.broadcast %cst_63 : f32 to vector<8x1xf32>
    %106 = arith.divf %104, %105 : vector<8x1xf32>
    %107 = vector.broadcast %99 : vector<8x1xf32> to vector<8x32xf32>
    %108 = arith.subf %91, %107 : vector<8x32xf32>
    %cst_64 = arith.constant 9.99999974E-6 : f32
    %109 = vector.broadcast %cst_64 : f32 to vector<8x1xf32>
    %110 = arith.addf %106, %109 : vector<8x1xf32>
    %111 = math.rsqrt %110 : vector<8x1xf32>
    %112 = vector.broadcast %111 : vector<8x1xf32> to vector<8x32xf32>
    %113 = arith.mulf %108, %112 : vector<8x32xf32>
    %114 = vector.broadcast %93 : vector<1x32xf32> to vector<8x32xf32>
    %115 = arith.mulf %113, %114 : vector<8x32xf32>
    %116 = vector.broadcast %95 : vector<1x32xf32> to vector<8x32xf32>
    %117 = arith.addf %115, %116 : vector<8x32xf32>
    %cst_65 = arith.constant 0.000000e+00 : f32
    %118 = vector.broadcast %cst_65 : f32 to vector<8x32xf32>
    %119 = arith.maximumf %117, %118 : vector<8x32xf32>
    %120 = tpu.concatenate %75, %119 in 1 : vector<8x32xf32>, vector<8x32xf32> -> vector<8x64xf32>
    %c0_66 = arith.constant 0 : index
    %c0_67 = arith.constant 0 : index
    %121 = vector.load %arg12[%c0_66, %c0_67] : memref<8x64xf32, #tpu.memory_space<vmem>>, vector<8x64xf32>
    tpu.vector_store %arg12[%c0_66, %c0_67], %120 {strides = array<i32>} : memref<8x64xf32, #tpu.memory_space<vmem>>, vector<8x64xf32>,
    return
  }
  func.func @transform_0(%arg0: i32) -> (i32, i32) {
    %c0_i32 = arith.constant 0 : i32
    %c0_i32_0 = arith.constant 0 : i32
    return %arg0, %c0_i32 : i32, i32
  }
  func.func @transform_1(%arg0: i32) -> (i32, i32) {
    %c0_i32 = arith.constant 0 : i32
    %c0_i32_0 = arith.constant 0 : i32
    %c0_i32_1 = arith.constant 0 : i32
    return %c0_i32, %c0_i32_0 : i32, i32
  }
  func.func @transform_2(%arg0: i32) -> (i32, i32) {
    %c0_i32 = arith.constant 0 : i32
    %c0_i32_0 = arith.constant 0 : i32
    %c0_i32_1 = arith.constant 0 : i32
    return %c0_i32, %c0_i32_0 : i32, i32
  }
  func.func @transform_3(%arg0: i32) -> (i32, i32) {
    %c0_i32 = arith.constant 0 : i32
    %c0_i32_0 = arith.constant 0 : i32
    %c0_i32_1 = arith.constant 0 : i32
    return %c0_i32, %c0_i32_0 : i32, i32
  }
  func.func @transform_4(%arg0: i32) -> (i32, i32) {
    %c0_i32 = arith.constant 0 : i32
    %c0_i32_0 = arith.constant 0 : i32
    %c0_i32_1 = arith.constant 0 : i32
    return %c0_i32, %c0_i32_0 : i32, i32
  }
  func.func @transform_5(%arg0: i32) -> (i32, i32, i32) {
    %c0_i32 = arith.constant 0 : i32
    %c0_i32_0 = arith.constant 0 : i32
    %c0_i32_1 = arith.constant 0 : i32
    %c0_i32_2 = arith.constant 0 : i32
    return %c0_i32, %c0_i32_0, %c0_i32_1 : i32, i32, i32
  }
  func.func @transform_6(%arg0: i32) -> (i32, i32, i32) {
    %c0_i32 = arith.constant 0 : i32
    %c0_i32_0 = arith.constant 0 : i32
    %c0_i32_1 = arith.constant 0 : i32
    %c0_i32_2 = arith.constant 0 : i32
    return %c0_i32, %c0_i32_0, %c0_i32_1 : i32, i32, i32
  }
  func.func @transform_7(%arg0: i32) -> (i32, i32, i32) {
    %c0_i32 = arith.constant 0 : i32
    %c0_i32_0 = arith.constant 0 : i32
    %c0_i32_1 = arith.constant 0 : i32
    %c0_i32_2 = arith.constant 0 : i32
    return %c0_i32, %c0_i32_0, %c0_i32_1 : i32, i32, i32
  }
  func.func @transform_8(%arg0: i32) -> (i32, i32, i32) {
    %c0_i32 = arith.constant 0 : i32
    %c0_i32_0 = arith.constant 0 : i32
    %c0_i32_1 = arith.constant 0 : i32
    %c0_i32_2 = arith.constant 0 : i32
    return %c0_i32, %c0_i32_0, %c0_i32_1 : i32, i32, i32
  }
  func.func @transform_9(%arg0: i32) -> (i32, i32, i32) {
    %c0_i32 = arith.constant 0 : i32
    %c0_i32_0 = arith.constant 0 : i32
    %c0_i32_1 = arith.constant 0 : i32
    %c0_i32_2 = arith.constant 0 : i32
    return %c0_i32, %c0_i32_0, %c0_i32_1 : i32, i32, i32
  }
  func.func @transform_10(%arg0: i32) -> (i32, i32, i32) {
    %c0_i32 = arith.constant 0 : i32
    %c0_i32_0 = arith.constant 0 : i32
    %c0_i32_1 = arith.constant 0 : i32
    %c0_i32_2 = arith.constant 0 : i32
    return %c0_i32, %c0_i32_0, %c0_i32_1 : i32, i32, i32
  }
  func.func @transform_11(%arg0: i32) -> (i32, i32) {
    %c0_i32 = arith.constant 0 : i32
    %c0_i32_0 = arith.constant 0 : i32
    return %arg0, %c0_i32 : i32, i32
  }
}

</mosaic_0001>

<bundles_post_ra>
// kernel: masknet_forward.1
= control target key start
LH: loop header
LB: loop body
LE: loop exit
PB: predicated region body
PF: predicated region fallthrough
CT: control target
= control target key end

     0   :  { %s1614_s0 = inlined_call_operand.vmem [shape: f32[16,32], index: 0, kind: input, shape index: {}]   ;;  %s1615_s1 = inlined_call_operand.vmem [shape: f32[1,32], index: 1, kind: input, shape index: {}]   ;;  %s1616_s2 = inlined_call_operand.vmem [shape: f32[1,32], index: 2, kind: input, shape index: {}]   ;;  %s1617_s3 = inlined_call_operand.vmem [shape: f32[32,128], index: 3, kind: input, shape index: {}]   ;;  %s1618_s4 = inlined_call_operand.vmem [shape: f32[1,128], index: 4, kind: input, shape index: {}]   ;;  %s1619_s5 = inlined_call_operand.vmem [shape: f32[2,64,32], index: 5, kind: input, shape index: {}]   ;;  %s1620_s6 = inlined_call_operand.vmem [shape: f32[2,1,32], index: 6, kind: input, shape index: {}]   ;;  %s1621_s7 = inlined_call_operand.vmem [shape: f32[2,32,32], index: 7, kind: input, shape index: {}]   ;;  %s1622_s8 = inlined_call_operand.vmem [shape: f32[2,1,32], index: 8, kind: input, shape index: {}]   ;;  %s1623_s9 = inlined_call_operand.vmem [shape: f32[2,1,32], index: 9, kind: input, shape index: {}]   ;;  %s1624_s10 = inlined_call_operand.vmem [shape: f32[2,1,32], index: 10, kind: input, shape index: {}]   ;;  %s1625_s11 = inlined_call_operand.hbm [shape: f32[16,64], index: 11, kind: output, shape index: {}]  }
   0x1   :  { %1626 = sst [smem:[#allocation5_spill]] %s1614_s0 }
   0x2   :  { %1627 = sst [smem:[#allocation6_spill]] %s1615_s1 }
   0x3   :  { %16 = vsyncpa [#allocation3], 0 }
   0x4   :  { %18 = vsyncpa [#allocation3 + $0x1], 0  ;;  %s1360_s17 = smov 0   ;;  %s1362_s18 = smov 0  }
   0x5   :  { %s1364_s19 = smov 0   ;;  %s1366_s20 = smov 0  }
   0x6 LB: > { %s1381_s21 = sadd.s32 4294967295, %s1292_s20   ;;  %s992_s22 = sadd.s32 4294967294, %s1292_s20   ;;  %s1292_s20 = sphi %s1366_s20, %s1635_s20   ;;  %s1288_s19 = sphi %s1364_s19, %s1634_s19   ;;  %s1284_s18 = sphi %s1362_s18, %s1633_s18   ;;  %s1280_s17 = sphi %s1360_s17, %s1632_s17  }
   0x7   : > { %s1385_s23 = sadd.s32 1, %s1292_s20   ;;  %s267_s24 = sadd.s32 1, %s1288_s19 }
   0x8   : > { %s264_s25 = ssub.s32 %s1292_s20, %s1385_s23  ;;  %p277_p0 = scmp.ne.s32.totalorder %s1288_s19, %s1284_s18 }
   0x9   : > { %p265_p1 = scmp.eq.s32.totalorder %s264_s25, 0  ;;  %p278_p2 = scmp.eq.s32.totalorder %s1381_s21, 1 }
   0xa   : > { %p283_p3 = scmp.ne.s32.totalorder %s1284_s18, %s1280_s17  ;;  %p284_p4 = scmp.eq.s32.totalorder %s992_s22, 1 }
   0xb   : > { %s1396_s26 = scalar_select %p265_p1, %s1288_s19, %s267_s24  }
   0xc   : > { %p1398_p5 = por %p278_p2, %p277_p0  ;;  %p1402_p6 = por %p284_p4, %p283_p3 }
   0xd   : > { %p995_p7 = scmp.ge.s32.totalorder %s1292_s20, 1  ;;  %p339_p8 = scmp.lt.s32.totalorder %s1292_s20, 3 }
   0xf   : > { %p340_p9 = pnand %p995_p7, %p339_p8 }
  0x10   : > { %v414_v0 = vld [vmem:[%s1617_s3] sm:$0xff] (!%p340_p9)  ;;  %v415_v1 = vld [vmem:[%s1617_s3 + $0x8] sm:$0xff] (!%p340_p9)  ;;  %v416_v2 = vld [vmem:[%s1617_s3 + $0x10] sm:$0xff] (!%p340_p9)  ;;  %p378_p10 = scmp.lt.s32.totalorder (!%p340_p9), %s1381_s21, 1  ;;  %v1294_v3 = vmov (!%p340_p9), 0.0|0.0   ;;  %vm1295_vm0 = vmmov (!%p340_p9), 0  }
  0x11   : > { %343 = sbr.rel (%p340_p9) target bundleno = 1352 (0x548), region = 64  ;;  %1138 = vmatprep.subr.bf16.mxu0 (!%p340_p9), %v1294_v3  ;;  %v1139_v4 = vpack.c.bf16 (!%p340_p9), %v415_v1, %v414_v0  ;;  %v417_v5 = vld [vmem:[%s1617_s3 + $0x18] sm:$0xff] (!%p340_p9)  ;;  %1144 = vmatprep.subr.bf16.mxu1 (!%p340_p9), %v1294_v3  ;;  %v1296_v6 = vmov (!%p340_p9), 0.0   ;;  %vm385_vm1 = vcmask (!%p340_p9), 261120   ;;  %s1630_s0 = sld [smem:[#allocation5_spill]] (!%p340_p9)  ;;  %v499_v10 = vld [vmem:[%s1619_s5] sm:$0xff] (!%p340_p9) }
  0x12   : > { %1075 = vmatprep.mubr.msk.f32.mxu0 (!%p340_p9), %vm1295_vm0, %v1296_v6  ;;  %1094 = vmatprep.mubr.msk.f32.mxu1 (!%p340_p9), %vm1295_vm0, %v1296_v6  ;;  %v1142_v7 = vpack.c.bf16 (!%p340_p9), %v417_v5, %v416_v2  ;;  %v500_v11 = vld [vmem:[%s1619_s5 + $0x8] sm:$0xff] (!%p340_p9)  ;;  %v501_v12 = vld [vmem:[%s1619_s5 + $0x10] sm:$0xff] (!%p340_p9)  ;;  %v502_v14 = vld [vmem:[%s1619_s5 + $0x18] sm:$0xff] (!%p340_p9)  ;;  %vm514_vm2 = vcmask (!%p340_p9), 523264   ;;  %s1297_s15 = smov (!%p340_p9), 64   ;;  %s1631_s1 = sld [smem:[#allocation6_spill]] (!%p340_p9) }
  0x13   : > { %1140 = vmatpush3.bf16.msra.mxu0 (!%p340_p9), %v1139_v4  ;;  %v1145_v13 = vpack.c.bf16 (!%p340_p9), %v500_v11, %v499_v10  ;;  %v1148_v15 = vpack.c.bf16 (!%p340_p9), %v502_v14, %v501_v12  ;;  %v503_v16 = vld [vmem:[%s1619_s5 + $0x20] sm:$0xff] (!%p340_p9)  ;;  %v504_v17 = vld [vmem:[%s1619_s5 + $0x28] sm:$0xff] (!%p340_p9)  ;;  %v505_v19 = vld [vmem:[%s1619_s5 + $0x30] sm:$0xff] (!%p340_p9)  ;;  %s1298_s29 = smov (!%p340_p9), 32   ;;  %s375_s13 = sand.u32 (!%p340_p9), 1, %s1284_s18  }
  0x14   : > { %1141 = vmatprep.subr.bf16.mxu0 (!%p340_p9), %v1294_v3  ;;  %v1151_v18 = vpack.c.bf16 (!%p340_p9), %v504_v17, %v503_v16  ;;  %v506_v20 = vld [vmem:[%s1619_s5 + $0x38] sm:$0xff] (!%p340_p9)  ;;  %v589_v27 = vld [vmem:[%s1621_s7] sm:$0xff] (!%p340_p9)  ;;  %v590_v28 = vld [vmem:[%s1621_s7 + $0x8] sm:$0xff] (!%p340_p9)  ;;  %s996_s14 = sshll.u32 (!%p340_p9), %s375_s13, 3  ;;  %s1031_s22 = sshll.u32 (!%p340_p9), %s1381_s21, 7 }
  0x15   : > { %1146 = vmatpush3.bf16.msra.mxu1 (!%p340_p9), %v1145_v13  ;;  %v1154_v21 = vpack.c.bf16 (!%p340_p9), %v506_v20, %v505_v19  ;;  %v1157_v29 = vpack.c.bf16 (!%p340_p9), %v590_v28, %v589_v27  ;;  %v1000_v30 = vld [vmem:[%s1618_s4] ss:$0 sm:$0xff] (!%p340_p9)  ;;  %v591_v35 = vld [vmem:[%s1621_s7 + $0x10] sm:$0xff] (!%p340_p9)  ;;  %v592_v36 = vld [vmem:[%s1621_s7 + $0x18] sm:$0xff] (!%p340_p9)  ;;  %s920_s30 = scalar_lea.sflag (!%p340_p9), [#allocation3], %s375_s13 }
  0x16   : > { %1147 = vmatprep.subr.bf16.mxu1 (!%p340_p9), %v1294_v3  ;;  %v1160_v37 = vpack.c.bf16 (!%p340_p9), %v592_v36, %v591_v35  ;;  %v999_v45 = vld [vmem:[%s1616_s2] ss:$0 sm:$0xff] (!%p340_p9)  ;;  %v1009_v48 = vld [vmem:[%s1619_s5 + $0x48] sm:$0xff] (!%p340_p9)  ;;  %v1010_v55 = vld [vmem:[%s1619_s5 + $0x50] sm:$0xff] (!%p340_p9) }
  0x17   : > { %1143 = vmatpush3.bf16.msra.mxu0 (!%p340_p9), %v1142_v7  ;;  %v1002_v46 = vld [vmem:[%s1620_s6] ss:$0 sm:$0xff] (!%p340_p9)  ;;  %v1011_v56 = vld [vmem:[%s1619_s5 + $0x58] sm:$0xff] (!%p340_p9)  ;;  %v1013_v59 = vld [vmem:[%s1619_s5 + $0x68] sm:$0xff] (!%p340_p9) }
  0x18   : > { %s379_s24 = scalar_select %p378_p10, %s1381_s21, 1  ;;  %1156 = vmatprep.subr.bf16.mxu0 %v1294_v3  ;;  %v998_v43 = vld [vmem:[%s1631_s1] ss:$0 sm:$0xff]  ;;  %v1166_v57 = vpack.c.bf16 %v1011_v56, %v1010_v55  ;;  %v1014_v61 = vld [vmem:[%s1619_s5 + $0x70] sm:$0xff]  ;;  %v1015_v62 = vld [vmem:[%s1619_s5 + $0x78] sm:$0xff] }
  0x19   : > { %1149 = vmatpush3.bf16.msra.mxu1 %v1148_v15  ;;  %v1008_v47 = vld [vmem:[%s1619_s5 + $0x40] sm:$0xff]  ;;  %v1172_v63 = vpack.c.bf16 %v1015_v62, %v1014_v61  ;;  %v1020_v2 = vld [vmem:[%s1621_s7 + $0x28] sm:$0xff]  ;;  %v1021_v5 = vld [vmem:[%s1621_s7 + $0x30] sm:$0xff]  ;;  %s1570_s1 = scalar_lea.hbm %s1625_s11, %s1031_s22 }
  0x1a   : > { %s997_s25 = sshll.u32 %s379_s24, 3  ;;  %1150 = vmatprep.subr.bf16.mxu1 %v1294_v3  ;;  %v1163_v53 = vpack.c.bf16 %v1009_v48, %v1008_v47  ;;  %v1012_v58 = vld [vmem:[%s1619_s5 + $0x60] sm:$0xff]  ;;  %s377_s24 = scalar_lea.vmem [#allocation2], %s996_s14 }
  0x1b   : > { %s381_s12 = scalar_lea.vmem %s1630_s0, %s997_s25  ;;  %v1169_v60 = vpack.c.bf16 %v1013_v59, %v1012_v58  ;;  %v1019_v1 = vld [vmem:[%s1621_s7 + $0x20] sm:$0xff]  ;;  %s933_s25 = sshll.u32 %s377_s24, 4  ;;  %s1572_s25 = int_to_ptr.vmem [resolvable:$true] %s933_s25 }
  0x1c   : > { %v382_v8 = vld [vmem:[%s381_s12] sm:$0xff]  ;;  %v1175_v4 = vpack.c.bf16 %v1020_v2, %v1019_v1  ;;  %s1230_s21 = scalar_lea.vmem %s1572_s25, 128  ;;  %s1299_s12 = smov [#allocation2]  }
  0x1d   : > { %v386_v9 = vsel %vm385_vm1, %v382_v8, 0.0  ;;  %1076 = vmatmul.mubr.msk.f32.vlgmr.msra.gmra.mrb[0].mxu0 %vm385_vm1, %v382_v8  ;;  %1152 = vmatpush3.bf16.msra.mxu1 %v1151_v18  ;;  %v1024_v17 = vld [vmem:[%s1622_s8 + $0x1] ss:$0 sm:$0xff]  ;;  %v1006_v47 = vld [vmem:[%s1623_s9] ss:$0 sm:$0xff]  ;;  %p1231_p11 = scmp.ne.s32.totalorder %s1572_s25, %s1230_s21  ;;  %s1234_s14 = sshll.u32 %s1299_s12, 4  ;;  %s1235_s14 = int_to_ptr.vmem [resolvable:$false] %s1234_s14 }
  0x1e   : > { %387 = vadd.xlane.f32.xlu0 %v386_v9  ;;  %1105 = vmatprep.mubr.msk.f32.mxu0 %vm1295_vm0, %v1296_v6  ;;  %v1028_v36 = vld [vmem:[%s1623_s9 + $0x1] ss:$0 sm:$0xff]  ;;  %s1236_s0 = scalar_lea.vmem %s1235_s14, 256  ;;  %p1237_p0 = scmp.lt.s32.totalorder %s1572_s25, %s1235_s14 }
  0x1f   : > { %1153 = vmatprep.subr.bf16.mxu1 %v1294_v3  ;;  %1158 = vmatpush3.bf16.msra.mxu0 %v1157_v29  ;;  %p1232_p12 = pnand %p1231_p11, %p1398_p5  ;;  %p1238_p1 = scmp.lt.s32.totalorder %s1236_s0, %s1230_s21 }
  0x20   : > { %1159 = vmatprep.subr.bf16.mxu0 %v1294_v3 }
  0x21   : > { %1155 = vmatpush3.bf16.msra.mxu1 %v1154_v21  ;;  %p1233_p13 = pneg %p1232_p12  ;;  %p1239_p2 = por %p1238_p1, %p1237_p0 }
  0x22   : > { %1174 = vmatprep.subr.bf16.mxu1 %v1294_v3 }
  0x23   : > { %1161 = vmatpush3.bf16.msra.mxu0 %v1160_v37  ;;  %p1240_p3 = pnand %p1239_p2, %p1233_p13 }
  0x24   : > { %1162 = vmatprep.subr.bf16.mxu0 %v1294_v3 }
  0xab   : > { %v388_v22 = vpop.xlane.xlu0 %387 }
  0xac   : > { %v390_v23 = vmul.f32 0.03125, %v388_v22 }
  0xae   : > { %v391_v24 = vsub.f32 %v382_v8, %v390_v23  ;;  %v1004_v8 = vld [vmem:[%s1622_s8] ss:$0 sm:$0xff] }
  0xb0   : > { %v392_v25 = vmul.f32 %v391_v24, %v391_v24 }
  0xb2   : > { %v393_v26 = vsel %vm385_vm1, %v392_v25, 0.0 }
  0xb3   : > { %394 = vadd.xlane.f32.xlu0 %v393_v26 }
  0xf0   : > { %v494_v31 = vpop.f32.mrb[0].mxu0 }
  0xf1   : > { %v495_v32 = vadd.f32 %v1000_v30, %v494_v31  ;;  %v1077_v33 = vpop.f32.mrb[1].mxu0 }
  0xf3   : > { %v498_v34 = vmax.f32 %v495_v32, 0.0 }
  0xf5   : > { %720 = vrot.lane.b32.xlu1 %v498_v34, %s1297_s15  ;;  %1095 = vmatmul.mubr.msk.f32.vlgmr.msra.gmra.mrb[0].mxu1 %vm514_vm2, %v498_v34 }
  0xf6   : > { %1135 = vmatprep.mubr.msk.f32.mxu1 %vm1295_vm0, %v1296_v6  ;;  %1176 = vmatpush3.bf16.msra.mxu1 %v1175_v4 }
  0xf7   : > { %1177 = vmatprep.subr.bf16.mxu1 %v1294_v3 }
 0x140   : > { %v395_v38 = vpop.xlane.xlu0 %394 }
 0x141   : > { %v396_v39 = vmul.f32 0.03125, %v395_v38  ;;  %v1029_v38 = vld [vmem:[%s1624_s10 + $0x1] ss:$0 sm:$0xff] }
 0x143   : > { %v397_v40 = vadd.f32 1e-05, %v396_v39 }
 0x145   : > { %1224 = vrsqrt.f32 %v397_v40 }
 0x14f   : > { %v1225_v41 = vpop.eup %1224 }
 0x150   : > { %v399_v42 = vmul.f32 %v1225_v41, %v391_v24 }
 0x152   : > { %v406_v44 = vmul.f32 %v998_v43, %v399_v42 }
 0x154   : > { %v413_v50 = vadd.f32 %v999_v45, %v406_v44 }
 0x167   : > { %v721_v0 = vpop.permute.xlu1 %720 }
 0x1c8   : > { %v584_v49 = vpop.f32.mrb[0].mxu1 }
 0x1c9   : > { %v585_v51 = vadd.f32 %v1002_v46, %v584_v49  ;;  %v1096_v52 = vpop.f32.mrb[1].mxu1  ;;  %v1007_v49 = vld [vmem:[%s1624_s10] ss:$0 sm:$0xff] }
 0x1cb   : > { %v588_v54 = vmul.f32 %v585_v51, %v413_v50 }
 0x1cd   : > { %1106 = vmatmul.mubr.msk.f32.vlgmr.msra.gmra.mrb[2].mxu0 %vm385_vm1, %v588_v54 }
 0x1ce   : > { %1164 = vmatpush3.bf16.msra.mxu0 %v1163_v53  ;;  %1124 = vmatprep.mubr.msk.f32.mxu0 %vm1295_vm0, %v1296_v6  ;;  %v1022_v6 = vld [vmem:[%s1621_s7 + $0x38] sm:$0xff] }
 0x1cf   : > { %1165 = vmatprep.subr.bf16.mxu0 %v1294_v3  ;;  %v1178_v7 = vpack.c.bf16 %v1022_v6, %v1021_v5 }
 0x1d1   : > { %1179 = vmatpush3.bf16.msra.mxu1 %v1178_v7 }
 0x1d2   : > { %1167 = vmatpush3.bf16.msra.mxu0 %v1166_v57 }
 0x1d3   : > { %1168 = vmatprep.subr.bf16.mxu0 %v1294_v3 }
 0x1d6   : > { %1170 = vmatpush3.bf16.msra.mxu0 %v1169_v60 }
 0x1d7   : > { %1171 = vmatprep.subr.bf16.mxu0 %v1294_v3  ;;  %v1017_v3 = vld [vmem:[%s1620_s6 + $0x1] ss:$0 sm:$0xff] }
 0x1da   : > { %1173 = vmatpush3.bf16.msra.mxu0 %v1172_v63 }
 0x1dd   : > { %1125 = vmatmul.mubr.msk.f32.vlgmr.msra.gmra.mrb[4].mxu0 %vm514_vm2, %v721_v0 }
 0x2a0   : > { %v669_v9 = vpop.f32.mrb[2].mxu0 }
 0x2a1   : > { %v670_v10 = vadd.f32 %v1004_v8, %v669_v9  ;;  %v1107_v11 = vpop.f32.mrb[3].mxu0 }
 0x2a3   : > { %v675_v12 = vsel %vm385_vm1, %v670_v10, 0.0 }
 0x2a4   : > { %676 = vadd.xlane.f32.xlu0 %v675_v12 }
 0x2b0   : > { %v790_v13 = vpop.f32.mrb[4].mxu0 }
 0x2b1   : > { %v791_v14 = vadd.f32 %v1017_v3, %v790_v13  ;;  %v1126_v15 = vpop.f32.mrb[5].mxu0 }
 0x2b3   : > { %v794_v16 = vmul.f32 %v791_v14, %v413_v50 }
 0x2b5   : > { %1136 = vmatmul.mubr.msk.f32.vlgmr.msra.gmra.mrb[2].mxu1 %vm385_vm1, %v794_v16 }
 0x331   : > { %v677_v22 = vpop.xlane.xlu0 %676 }
 0x332   : > { %v678_v23 = vmul.f32 0.03125, %v677_v22 }
 0x334   : > { %v679_v26 = vsub.f32 %v670_v10, %v678_v23 }
 0x336   : > { %v680_v30 = vmul.f32 %v679_v26, %v679_v26 }
 0x338   : > { %v681_v31 = vsel %vm385_vm1, %v680_v30, 0.0 }
 0x388   : > { %v877_v18 = vpop.f32.mrb[2].mxu1 }
 0x389   : > { %v878_v19 = vadd.f32 %v1024_v17, %v877_v18  ;;  %v1137_v20 = vpop.f32.mrb[3].mxu1 }
 0x38b   : > { %v885_v21 = vsel %vm385_vm1, %v878_v19, 0.0 }
 0x38c   : > { %886 = vadd.xlane.f32.xlu1 %v885_v21 }
 0x419   : > { %v887_v24 = vpop.xlane.xlu1 %886 }
 0x41a   : > { %v888_v25 = vmul.f32 0.03125, %v887_v24 }
 0x41c   : > { %v889_v27 = vsub.f32 %v878_v19, %v888_v25 }
 0x41e   : > { %v890_v28 = vmul.f32 %v889_v27, %v889_v27 }
 0x420   : > { %v891_v29 = vsel %vm385_vm1, %v890_v28, 0.0 }
 0x421   : > { %892 = vadd.xlane.f32.xlu0 %v891_v29 }
 0x425   : > { %682 = vadd.xlane.f32.xlu0 %v681_v31 }
 0x4ae   : > { %v893_v32 = vpop.xlane.xlu0 %892 }
 0x4af   : > { %v894_v33 = vmul.f32 0.03125, %v893_v32 }
 0x4b1   : > { %v895_v34 = vadd.f32 1e-05, %v894_v33 }
 0x4b2   : > { %v683_v42 = vpop.xlane.xlu0 %682 }
 0x4b3   : > { %1226 = vrsqrt.f32 %v895_v34  ;;  %v684_v43 = vmul.f32 0.03125, %v683_v42 }
 0x4b5   : > { %v685_v44 = vadd.f32 1e-05, %v684_v43 }
 0x4b7   : > { %1228 = vrsqrt.f32 %v685_v44 }
 0x4bd   : > { %v1227_v35 = vpop.eup %1226 }
 0x4be   : > { %v897_v37 = vmul.f32 %v1227_v35, %v889_v27 }
 0x4c0   : > { %v904_v39 = vmul.f32 %v1028_v36, %v897_v37 }
 0x4c1   : > { %v1229_v45 = vpop.eup %1228 }
 0x4c2   : > { %v911_v40 = vadd.f32 %v1029_v38, %v904_v39  ;;  %v687_v46 = vmul.f32 %v1229_v45, %v679_v26 }
 0x4c4   : > { %v912_v41 = vmax.f32 %v911_v40, 0.0  ;;  %v694_v48 = vmul.f32 %v1006_v47, %v687_v46 }
 0x4c6   : > { %914 = vrot.lane.b32.xlu0 %v912_v41, %s1298_s29  ;;  %v701_v50 = vadd.f32 %v1007_v49, %v694_v48 }
 0x4c8   : > { %v702_v51 = vmax.f32 %v701_v50, 0.0 }
 0x538   : > { %v915_v52 = vpop.permute.xlu0 %914 }
 0x539   : > { %v917_v53 = vsel %vm385_vm1, %v702_v51, %v915_v52 }
 0x53a   : > { %918 = vst.msk [vmem:[%s377_s24] sm:$0xff] %vm514_vm2, %v917_v53 }
 0x53b   : > { %1243 = shalt.err (!%p1240_p3)
}
 0x53c   : > { %s1244_s13 = scalar_lea.hbm %s1570_s1, 128  ;;  %s1248_s22 = scalar_lea.hbm %s1625_s11, 256 }
 0x53d   : > { %p1245_p4 = scmp.ne.s32.totalorder %s1570_s1, %s1244_s13  ;;  %p1249_p9 = scmp.lt.u32.totalorder %s1570_s1, %s1625_s11 }
 0x53e   : > { %p1250_p10 = scmp.lt.u32.totalorder %s1248_s22, %s1244_s13  ;;  %p1252_p12 = scmp.lt.u32.totalorder %s1244_s13, %s1570_s1 }
 0x53f   : > { %p1246_p7 = pnand %p1245_p4, %p1398_p5 }
 0x540   : > { %p1251_p11 = por %p1250_p10, %p1249_p9 }
 0x541   : > { %p1247_p8 = pneg %p1246_p7 }
 0x542   : > { %p1253_p13 = por %p1252_p12, %p1251_p11 }
 0x544   : > { %p1254_p0 = pnand %p1253_p13, %p1247_p8 }
 0x546   : > { %1257 = shalt.err (!%p1254_p0)
}
 0x547   : > { %1180 = dma.vmem_to_hbm [thread:$0]  (%p1398_p5), %s1572_s25, 128, %s1570_s1, %s920_s30  }
 0x548 PF: > { %p1186_p1 = scmp.ge.s32.totalorder %s1292_s20, 2  ;;  %s945_s21 = sand.u32 1, %s1280_s17  }
 0x549   : > { %s946_s12 = scalar_lea.sflag [#allocation3], %s945_s21 }
 0x54a   : > { %p1183_p2 = pnand %p1186_p1, %p1402_p6 }
 0x54c   : > { %1275 = dma.done.wait (!%p1183_p2), %s946_s12, 128  }
 0x54d   : > { %1277 = vsyncadd (!%p1183_p2), %s946_s12, 4294967168  ;;  %p21_p3 = scmp.ge.s32.totalorder %s1385_s23, 4   ;;  %s1632_s17 = smov %s1284_s18 }
 0x54e   : > { %s1633_s18 = smov %s1288_s19  ;;  %s1634_s19 = smov %s1396_s26 }
 0x54f   : > { %s1635_s20 = smov %s1385_s23  ;;  %23 = sbr.rel (!%p21_p3) target bundleno = 6 (0x6), region = 105 }
 0x556   :  { %951 = vsyncpa [#allocation3], 1 }
 0x557   :  { %953 = vsyncpa [#allocation3 + $0x1], 1 }

</bundles_post_ra>
